<compile_context>
chip_gen: v7x
topology: tpu7x:2x2x1
jax: 0.10.0
libtpu: 0.0.40
codegen_flags: <defaults>
</compile_context>

<pallas_src>
import jax
import jax.numpy as jnp
from jax import lax
from jax.experimental import pallas as pl
from jax.experimental.pallas import tpu as pltpu


def _round_up(x, m):
    return ((x + m - 1) // m) * m


def _sublane_multiple(dtype):
    # f32 -> 8, bf16 -> 16, int8/fp8 -> 32 (packed sublane multiples).
    return max(8, 32 // max(1, jnp.dtype(dtype).itemsize))


def _vmem_budgets():
    """(tile-sizing budget, scoped vmem limit), scaled to the chip's VMEM size."""
    cap = 64 * 1024 * 1024
    try:
        cap = pltpu.get_tpu_info().vmem_capacity_bytes
    except Exception:
        pass  # conservative default (v7x-sized) if the query is unavailable
    if cap >= 128 * 1024 * 1024:                 # v5e / v6e: 128 MiB physical
        return 48 * 1024 * 1024, 64 * 1024 * 1024
    return 24 * 1024 * 1024, 32 * 1024 * 1024   # v7x: 64 MiB per TensorCore


def _resident_spec(shape):
    """BlockSpec for a block whose index never changes across the grid.

    Single-buffered (pl.Buffered(1)) when supported: a constant-index block gains
    nothing from double buffering, and halving its VMEM footprint frees budget for
    larger row tiles (matters most on v7x's 64 MiB VMEM).
    """
    index_map = lambda *_: (0,) * len(shape)
    try:
        return pl.BlockSpec(shape, index_map, pipeline_mode=pl.Buffered(1))
    except Exception:
        return pl.BlockSpec(shape, index_map)


# ----------------------------------------------------------------------------
# Kernel 1: generic residual add  (out = y + x), y = fn(x) computed elsewhere.
# ----------------------------------------------------------------------------
def _residual_add_kernel(y_ref, x_ref, o_ref):
    o_ref[...] = y_ref[...] + x_ref[...]


def residual_add(y, x, *, max_block_rows=2048):
    """Element-wise residual add for arbitrary (equal) shapes via Pallas.

    Flattens to a lane-dense (rows, lane) slab where `lane` is the widest of
    {2048,1024,512,256,128} that divides the element count (reshape is then free —
    no pad copy), and tiles rows with a cdiv grid so the ragged last block is
    masked instead of padded.
    """
    assert y.shape == x.shape and y.dtype == x.dtype
    orig_shape = x.shape
    T = x.size
    itemsize = jnp.dtype(x.dtype).itemsize
    sub = _sublane_multiple(x.dtype)
    budget, limit = _vmem_budgets()

    y1 = y.reshape(-1)
    x1 = x.reshape(-1)

    lane = None
    for cand in (2048, 1024, 512, 256, 128):
        if T % cand == 0:
            lane = cand
            break
    T_pad = T
    if lane is None:
        # TODO(synk): rare non-128-divisible sizes still pad the flat arrays (full
        # copy); a tail-split into a tiny second kernel would avoid that traffic.
        lane = 128
        T_pad = _round_up(T, lane)
        y1 = jnp.pad(y1, (0, T_pad - T))
        x1 = jnp.pad(x1, (0, T_pad - T))

    rows = T_pad // lane
    y2 = y1.reshape(rows, lane)
    x2 = x1.reshape(rows, lane)

    # 3 arrays (y, x, out) x 2 pipeline buffers per tile must fit the VMEM budget.
    rows_budget = max(sub, budget // (3 * 2 * lane * itemsize))
    block_rows = min(max_block_rows, rows_budget, _round_up(rows, sub))
    # >=2 grid blocks when possible so v7x's two TensorCores both get work.
    if rows > 2 * sub:
        block_rows = min(block_rows, _round_up(pl.cdiv(rows, 2), sub))
    block_rows = max(sub, (block_rows // sub) * sub)

    grid = (pl.cdiv(rows, block_rows),)   # ragged last block is masked (no pad copy)
    out = pl.pallas_call(
        _residual_add_kernel,
        out_shape=jax.ShapeDtypeStruct((rows, lane), x.dtype),
        grid_spec=pltpu.PrefetchScalarGridSpec(
            num_scalar_prefetch=0,
            grid=grid,
            in_specs=[
                pl.BlockSpec((block_rows, lane), lambda i: (i, 0)),
                pl.BlockSpec((block_rows, lane), lambda i: (i, 0)),
            ],
            out_specs=pl.BlockSpec((block_rows, lane), lambda i: (i, 0)),
        ),
        compiler_params=pltpu.CompilerParams(
            dimension_semantics=("parallel",),
            vmem_limit_bytes=limit),
    )(y2, x2)

    out = out.reshape(-1)
    if T_pad != T:
        out = out[:T]
    return out.reshape(orig_shape)


class Residual:
    """JAX analogue of the PyTorch Residual module: fn(x, **kwargs) + x.

    A standalone add re-reads fn(x) and x from HBM; when the wrapped fn is itself a
    Pallas kernel (e.g. the FeedForward below), prefer fusing `+ x` into that
    kernel's epilogue — see residual_feedforward().
    """

    def __init__(self, fn):
        self.fn = fn

    def __call__(self, x, **kwargs):
        return residual_add(self.fn(x, **kwargs), x)


# ----------------------------------------------------------------------------
# Kernel 2: fused Residual(FeedForward) — matmul + GELU + matmul + residual add.
# ----------------------------------------------------------------------------
def _fused_residual_ffn_kernel(x_ref, w1_ref, b1_ref, w2_ref, b2_ref, o_ref):
    x = x_ref[...]                                            # native dtype (bf16/f32)
    h = jnp.dot(x, w1_ref[...], preferred_element_type=jnp.float32)
    # TODO(synk): PyTorch nn.GELU defaults to the exact erf form; tanh-approx GELU is
    # used here for the EUP fast path (the wrapped fn is outside the Residual spec).
    h = jax.nn.gelu(h + b1_ref[...].astype(jnp.float32), approximate=True)
    y = jnp.dot(h.astype(w2_ref.dtype), w2_ref[...],
                preferred_element_type=jnp.float32)
    y = y + b2_ref[...].astype(jnp.float32)
    if o_ref.dtype == jnp.float32:
        o_ref[...] = y + x.astype(jnp.float32)
    else:
        # Residual add in the output dtype: halves the live f32 epilogue vregs.
        o_ref[...] = y.astype(o_ref.dtype) + x


def _fused_residual_ffn_ktiled_kernel(x_ref, w1_ref, b1_ref, w2_ref, b2_ref,
                                      o_ref, acc_ref):
    h_idx = pl.program_id(1)

    @pl.when(h_idx == 0)
    def _():
        acc_ref[...] = jnp.zeros_like(acc_ref)

    x = x_ref[...]
    h = jnp.dot(x, w1_ref[...], preferred_element_type=jnp.float32)
    h = jax.nn.gelu(h + b1_ref[...].astype(jnp.float32), approximate=True)
    acc_ref[...] += jnp.dot(h.astype(w2_ref.dtype), w2_ref[...],
                            preferred_element_type=jnp.float32)

    @pl.when(h_idx == pl.num_programs(1) - 1)
    def _():
        y = acc_ref[...] + b2_ref[...].astype(jnp.float32)
        if o_ref.dtype == jnp.float32:
            o_ref[...] = y + x.astype(jnp.float32)
        else:
            o_ref[...] = y.astype(o_ref.dtype) + x


def _pick_block_h(H, target):
    """Largest multiple of 128 <= target that divides H exactly (0 if none)."""
    c = (min(target, H) // 128) * 128
    while c >= 128:
        if H % c == 0:
            return c
        c -= 128
    return 0


def residual_feedforward(x, w1, b1, w2, b2, *, max_block_rows=512,
                         block_h_target=512, force_h_tiling=False):
    """out = (GELU(x @ w1 + b1) @ w2 + b2) + x   with x: [B, N, D]."""
    B, N, D = x.shape
    H = w1.shape[1]
    assert w1.shape == (D, H) and w2.shape == (H, D)
    assert b1.shape == (H,) and b2.shape == (D,)
    M = B * N
    x2 = x.reshape(M, D)
    b1_2 = b1.reshape(1, H)
    b2_2 = b2.reshape(1, D)

    x_bytes = jnp.dtype(x.dtype).itemsize
    w_bytes = jnp.dtype(w1.dtype).itemsize
    sub = _sublane_multiple(x.dtype)
    budget, limit = _vmem_budgets()

    # Resident path cost: weights single-buffered; x/out tiles double-buffered;
    # f32 hidden + output temporaries.
    weight_bytes = (D * H + H * D + H + D) * w_bytes
    per_row_res = 2 * 2 * D * x_bytes + 4 * H + 4 * D
    resident_rows = (budget - weight_bytes) // per_row_res

    block_h = _pick_block_h(H, block_h_target)
    need_rows = min(128, _round_up(M, sub))
    use_ktiled = block_h > 0 and (force_h_tiling or resident_rows < need_rows)

    if not use_ktiled:
        # TODO(synk): if H is not a multiple of 128 AND weights exceed the VMEM budget,
        # this path may fail to fit; a D-axis output tiling would cover that corner.
        block_rows = min(max_block_rows, max(sub, resident_rows), _round_up(M, sub))
        if M > 2 * sub:
            block_rows = min(block_rows, _round_up(pl.cdiv(M, 2), sub))
        block_rows = max(sub, (block_rows // sub) * sub)
        grid = (pl.cdiv(M, block_rows),)          # ragged last row block is masked

        out = pl.pallas_call(
            _fused_residual_ffn_kernel,
            out_shape=jax.ShapeDtypeStruct((M, D), x.dtype),
            grid_spec=pltpu.PrefetchScalarGridSpec(
                num_scalar_prefetch=0,
                grid=grid,
                in_specs=[
                    pl.BlockSpec((block_rows, D), lambda i: (i, 0)),  # x rows
                    _resident_spec((D, H)),                           # w1 (resident, 1-buf)
                    _resident_spec((1, H)),                           # b1
                    _resident_spec((H, D)),                           # w2
                    _resident_spec((1, D)),                           # b2
                ],
                out_specs=pl.BlockSpec((block_rows, D), lambda i: (i, 0)),
            ),
            compiler_params=pltpu.CompilerParams(
                dimension_semantics=("parallel",),
                vmem_limit_bytes=limit),
        )(x2, w1, b1_2, w2, b2_2)
        return out.reshape(B, N, D)

    # ---- K-tiled path: hidden dim H is a reduction grid axis with f32 accumulator ----
    # H tiles of w1/w2/b1 are double-buffered (they change every step); b2 resident.
    wk_bytes = 2 * (D * block_h + block_h * D + block_h) * w_bytes + D * w_bytes
    per_row = 2 * 2 * D * x_bytes + 4 * D + 4 * block_h
    rows_budget = max(sub, (budget - wk_bytes) // per_row)
    block_rows = min(max_block_rows, rows_budget, _round_up(M, sub))
    if M > 2 * sub:
        block_rows = min(block_rows, _round_up(pl.cdiv(M, 2), sub))
    block_rows = max(sub, (block_rows // sub) * sub)
    grid = (pl.cdiv(M, block_rows), H // block_h)

    out = pl.pallas_call(
        _fused_residual_ffn_ktiled_kernel,
        out_shape=jax.ShapeDtypeStruct((M, D), x.dtype),
        grid_spec=pltpu.PrefetchScalarGridSpec(
            num_scalar_prefetch=0,
            grid=grid,
            in_specs=[
                pl.BlockSpec((block_rows, D), lambda i, h: (i, 0)),   # x rows
                pl.BlockSpec((D, block_h), lambda i, h: (0, h)),      # w1 H-tile
                pl.BlockSpec((1, block_h), lambda i, h: (0, h)),      # b1 H-tile
                pl.BlockSpec((block_h, D), lambda i, h: (h, 0)),      # w2 H-tile
                _resident_spec((1, D)),                               # b2
            ],
            out_specs=pl.BlockSpec((block_rows, D), lambda i, h: (i, 0)),
            scratch_shapes=[pltpu.VMEM((block_rows, D), jnp.float32)],
        ),
        compiler_params=pltpu.CompilerParams(
            dimension_semantics=("parallel", "arbitrary"),
            vmem_limit_bytes=limit),
    )(x2, w1, b1_2, w2, b2_2)
    return out.reshape(B, N, D)


# ----------------------------------------------------------------------------
# Demo / self-check
# ----------------------------------------------------------------------------
if __name__ == "__main__":
    key = jax.random.PRNGKey(0)
    kx, k1, k2, k3, k4 = jax.random.split(key, 5)

    # Small shapes consistent with a transformer-style Residual(FeedForward) block.
    B, N, D, H = 2, 8, 32, 64
    x = jax.random.normal(kx, (B, N, D), dtype=jnp.float32)
    w1 = jax.random.normal(k1, (D, H), dtype=jnp.float32) * 0.05
    b1 = jax.random.normal(k2, (H,), dtype=jnp.float32) * 0.05
    w2 = jax.random.normal(k3, (H, D), dtype=jnp.float32) * 0.05
    b2 = jax.random.normal(k4, (D,), dtype=jnp.float32) * 0.05

    def ffn(xv, w1v, b1v, w2v, b2v):
        h = jax.nn.gelu(jnp.dot(xv, w1v, precision=lax.Precision.HIGHEST) + b1v,
                        approximate=True)
        return jnp.dot(h, w2v, precision=lax.Precision.HIGHEST) + b2v

    ref = ffn(x, w1, b1, w2, b2) + x

    # Path A: fused resident-weight kernel (matmuls + GELU + residual add), f32.
    out_fused = jax.block_until_ready(residual_feedforward(x, w1, b1, w2, b2))
    assert out_fused.shape == x.shape and out_fused.dtype == x.dtype
    assert jnp.allclose(out_fused, ref, atol=1e-5, rtol=1e-5)

    # Path A': same kernel with bf16 operands (f32 MXU accumulation, bf16 residual add).
    out_bf16 = jax.block_until_ready(
        residual_feedforward(x.astype(jnp.bfloat16), w1.astype(jnp.bfloat16),
                             b1.astype(jnp.bfloat16), w2.astype(jnp.bfloat16),
                             b2.astype(jnp.bfloat16)))
    assert out_bf16.dtype == jnp.bfloat16
    assert jnp.allclose(out_bf16.astype(jnp.float32), ref, atol=5e-2, rtol=5e-2)

    # Path A'': K-tiled (hidden-dim reduction grid axis) path — the v7x fallback for
    # large D/H — exercised explicitly at a slightly larger hidden size.
    D2, H2 = 128, 256
    k5, k6, k7, k8, k9 = jax.random.split(jax.random.PRNGKey(1), 5)
    x_l = jax.random.normal(k5, (2, 16, D2), dtype=jnp.float32)
    w1_l = jax.random.normal(k6, (D2, H2), dtype=jnp.float32) * 0.05
    b1_l = jax.random.normal(k7, (H2,), dtype=jnp.float32) * 0.05
    w2_l = jax.random.normal(k8, (H2, D2), dtype=jnp.float32) * 0.05
    b2_l = jax.random.normal(k9, (D2,), dtype=jnp.float32) * 0.05
    ref_l = ffn(x_l, w1_l, b1_l, w2_l, b2_l) + x_l
    out_kt = jax.block_until_ready(
        residual_feedforward(x_l, w1_l, b1_l, w2_l, b2_l,
                             force_h_tiling=True, block_h_target=128))
    assert jnp.allclose(out_kt, ref_l, atol=1e-4, rtol=1e-4)

    # Path B: literal Residual module (lane-dense Pallas residual add over fn(x)).
    out_generic = jax.block_until_ready(
        Residual(lambda xv: ffn(xv, w1, b1, w2, b2))(x))
    assert out_generic.shape == x.shape
    assert jnp.allclose(out_generic, ref, atol=1e-5, rtol=1e-5)

    print("KERNEL_OK")
</pallas_src>

<mosaic_0001>
module attributes {stable_mosaic.version = 11 : i64} {
  func.func @_fused_residual_ffn_kernel(%arg0: i32, %arg1: memref<16x32xf32, #tpu.memory_space<vmem>>, %arg2: memref<32x64xf32, #tpu.memory_space<vmem>>, %arg3: memref<1x64xf32, #tpu.memory_space<vmem>>, %arg4: memref<64x32xf32, #tpu.memory_space<vmem>>, %arg5: memref<1x32xf32, #tpu.memory_space<vmem>>, %arg6: memref<16x32xf32, #tpu.memory_space<vmem>>) attributes {dimension_semantics = [#tpu.dimension_semantics<parallel>], iteration_bounds = array<i64: 1>, scalar_prefetch = 0 : i64, scratch_operands = 0 : i64, tpu.core_type = #tpu.core_type<tc>, window_params = [{transform_indices = @transform_0, window_bounds = array<i64: 16, 32>}, {pipeline_mode = #tpu.pipeline_mode<synchronous>, transform_indices = @transform_1, window_bounds = array<i64: 32, 64>}, {pipeline_mode = #tpu.pipeline_mode<synchronous>, transform_indices = @transform_2, window_bounds = array<i64: 1, 64>}, {pipeline_mode = #tpu.pipeline_mode<synchronous>, transform_indices = @transform_3, window_bounds = array<i64: 64, 32>}, {pipeline_mode = #tpu.pipeline_mode<synchronous>, transform_indices = @transform_4, window_bounds = array<i64: 1, 32>}, {transform_indices = @transform_5, window_bounds = array<i64: 16, 32>}]} {
    %c0 = arith.constant 0 : index
    %c0_0 = arith.constant 0 : index
    %0 = vector.load %arg1[%c0, %c0_0] : memref<16x32xf32, #tpu.memory_space<vmem>>, vector<16x32xf32>
    %c0_1 = arith.constant 0 : index
    %c0_2 = arith.constant 0 : index
    %1 = vector.load %arg2[%c0_1, %c0_2] : memref<32x64xf32, #tpu.memory_space<vmem>>, vector<32x64xf32>
    %cst = arith.constant dense<0.000000e+00> : vector<16x64xf32>
    %2 = tpu.matmul %0, %1, %cst {dimension_numbers = #tpu.dot_dimension_numbers<[1], [0], [0], [1], [0, 0, 1, 1], [], []>} : vector<16x32xf32>, vector<32x64xf32>, vector<16x64xf32> -> vector<16x64xf32>
    %c0_3 = arith.constant 0 : index
    %c0_4 = arith.constant 0 : index
    %3 = vector.load %arg3[%c0_3, %c0_4] : memref<1x64xf32, #tpu.memory_space<vmem>>, vector<1x64xf32>
    %4 = vector.broadcast %3 : vector<1x64xf32> to vector<16x64xf32>
    %5 = arith.addf %2, %4 : vector<16x64xf32>
    %6 = arith.mulf %5, %5 : vector<16x64xf32>
    %7 = arith.mulf %5, %6 : vector<16x64xf32>
    %cst_5 = arith.constant 4.471500e-02 : f32
    %8 = vector.broadcast %cst_5 : f32 to vector<16x64xf32>
    %9 = arith.mulf %8, %7 : vector<16x64xf32>
    %10 = arith.addf %5, %9 : vector<16x64xf32>
    %cst_6 = arith.constant 0.797884583 : f32
    %11 = vector.broadcast %cst_6 : f32 to vector<16x64xf32>
    %12 = arith.mulf %11, %10 : vector<16x64xf32>
    %13 = math.tanh %12 : vector<16x64xf32>
    %cst_7 = arith.constant 1.000000e+00 : f32
    %14 = vector.broadcast %cst_7 : f32 to vector<16x64xf32>
    %15 = arith.addf %14, %13 : vector<16x64xf32>
    %cst_8 = arith.constant 5.000000e-01 : f32
    %16 = vector.broadcast %cst_8 : f32 to vector<16x64xf32>
    %17 = arith.mulf %16, %15 : vector<16x64xf32>
    %18 = arith.mulf %5, %17 : vector<16x64xf32>
    %c0_9 = arith.constant 0 : index
    %c0_10 = arith.constant 0 : index
    %19 = vector.load %arg4[%c0_9, %c0_10] : memref<64x32xf32, #tpu.memory_space<vmem>>, vector<64x32xf32>
    %cst_11 = arith.constant dense<0.000000e+00> : vector<16x32xf32>
    %20 = tpu.matmul %18, %19, %cst_11 {dimension_numbers = #tpu.dot_dimension_numbers<[1], [0], [0], [1], [0, 0, 1, 1], [], []>} : vector<16x64xf32>, vector<64x32xf32>, vector<16x32xf32> -> vector<16x32xf32>
    %c0_12 = arith.constant 0 : index
    %c0_13 = arith.constant 0 : index
    %21 = vector.load %arg5[%c0_12, %c0_13] : memref<1x32xf32, #tpu.memory_space<vmem>>, vector<1x32xf32>
    %22 = vector.broadcast %21 : vector<1x32xf32> to vector<16x32xf32>
    %23 = arith.addf %20, %22 : vector<16x32xf32>
    %24 = arith.addf %23, %0 : vector<16x32xf32>
    %c0_14 = arith.constant 0 : index
    %c0_15 = arith.constant 0 : index
    %25 = vector.load %arg6[%c0_14, %c0_15] : memref<16x32xf32, #tpu.memory_space<vmem>>, vector<16x32xf32>
    tpu.vector_store %arg6[%c0_14, %c0_15], %24 {strides = array<i32>} : memref<16x32xf32, #tpu.memory_space<vmem>>, vector<16x32xf32>,
    return
  }
  func.func @transform_0(%arg0: i32) -> (i32, i32) {
    %c0_i32 = arith.constant 0 : i32
    %c0_i32_0 = arith.constant 0 : i32
    return %arg0, %c0_i32 : i32, i32
  }
  func.func @transform_1(%arg0: i32) -> (i32, i32) {
    %c0_i32 = arith.constant 0 : i32
    %c0_i32_0 = arith.constant 0 : i32
    %c0_i32_1 = arith.constant 0 : i32
    return %c0_i32, %c0_i32_0 : i32, i32
  }
  func.func @transform_2(%arg0: i32) -> (i32, i32) {
    %c0_i32 = arith.constant 0 : i32
    %c0_i32_0 = arith.constant 0 : i32
    %c0_i32_1 = arith.constant 0 : i32
    return %c0_i32, %c0_i32_0 : i32, i32
  }
  func.func @transform_3(%arg0: i32) -> (i32, i32) {
    %c0_i32 = arith.constant 0 : i32
    %c0_i32_0 = arith.constant 0 : i32
    %c0_i32_1 = arith.constant 0 : i32
    return %c0_i32, %c0_i32_0 : i32, i32
  }
  func.func @transform_4(%arg0: i32) -> (i32, i32) {
    %c0_i32 = arith.constant 0 : i32
    %c0_i32_0 = arith.constant 0 : i32
    %c0_i32_1 = arith.constant 0 : i32
    return %c0_i32, %c0_i32_0 : i32, i32
  }
  func.func @transform_5(%arg0: i32) -> (i32, i32) {
    %c0_i32 = arith.constant 0 : i32
    %c0_i32_0 = arith.constant 0 : i32
    return %arg0, %c0_i32 : i32, i32
  }
}

</mosaic_0001>

<bundles_post_ra>
// kernel: tpu_custom_call.1
= control target key start
LH: loop header
LB: loop body
LE: loop exit
PB: predicated region body
PF: predicated region fallthrough
CT: control target
= control target key end

     0   :  { %vm34_vm0 = vcmask 261120   ;;  %s459_s0 = inlined_call_operand.vmem [shape: f32[16,32], index: 0, kind: input, shape index: {}]   ;;  %s460_s1 = inlined_call_operand.vmem [shape: f32[32,64], index: 1, kind: input, shape index: {}]   ;;  %s461_s2 = inlined_call_operand.vmem [shape: f32[1,64], index: 2, kind: input, shape index: {}]   ;;  %s462_s3 = inlined_call_operand.vmem [shape: f32[64,32], index: 3, kind: input, shape index: {}]   ;;  %s463_s4 = inlined_call_operand.vmem [shape: f32[1,32], index: 4, kind: input, shape index: {}]   ;;  %s464_s5 = inlined_call_operand.hbm [shape: f32[16,32], index: 5, kind: output, shape index: {}]  }
   0x1   :  { %v23_v0 = vld [vmem:[%s460_s1] sm:$0xff]  ;;  %v24_v1 = vld [vmem:[%s460_s1 + $0x8] sm:$0xff]  ;;  %v25_v2 = vld [vmem:[%s460_s1 + $0x10] sm:$0xff] }
   0x2   :  { %v303_v3 = vpack.c.bf16 %v24_v1, %v23_v0  ;;  %v26_v4 = vld [vmem:[%s460_s1 + $0x18] sm:$0xff]  ;;  %v406_v5 = vld [vmem:[%s459_s0] sm:$0xff] }
   0x3   :  { %v307_v6 = vpack.c.bf16 %v26_v4, %v25_v2  ;;  %281 = vmatprep.mubr.msk.f32.mxu0 %vm34_vm0, %v406_v5 }
   0x4   :  { %10 = vsyncpa [#allocation3], 0  ;;  %304 = vmatprep.subr.bf16.mxu0 %v303_v3  ;;  %v22_v7 = vld [vmem:[%s459_s0 + $0x8] sm:$0xff]  ;;  %v134_v8 = vld [vmem:[%s462_s3] sm:$0xff]  ;;  %vm149_vm1 = vcmask 523264   ;;  %s358_s21 = smov [#allocation2]  }
   0x5   :  { %306 = vmatpush3.bf16.msra.mxu0 %v303_v3  ;;  %v135_v9 = vld [vmem:[%s462_s3 + $0x8] sm:$0xff]  ;;  %v136_v10 = vld [vmem:[%s462_s3 + $0x10] sm:$0xff]  ;;  %v137_v12 = vld [vmem:[%s462_s3 + $0x18] sm:$0xff]  ;;  %s240_s22 = sshll.u32 %s358_s21, 4  ;;  %s241_s22 = int_to_ptr.vmem [resolvable:$true] %s240_s22 }
   0x6   :  { %308 = vmatprep.subr.bf16.mxu0 %v307_v6  ;;  %v311_v11 = vpack.c.bf16 %v135_v9, %v134_v8  ;;  %v315_v13 = vpack.c.bf16 %v137_v12, %v136_v10  ;;  %v138_v14 = vld [vmem:[%s462_s3 + $0x20] sm:$0xff]  ;;  %v139_v15 = vld [vmem:[%s462_s3 + $0x28] sm:$0xff]  ;;  %v140_v17 = vld [vmem:[%s462_s3 + $0x30] sm:$0xff]  ;;  %s334_s23 = scalar_lea.vmem %s241_s22, 256  ;;  %p339_p1 = scmp.lt.s32.totalorder %s241_s22, %s241_s22 }
   0x7   :  { %v319_v16 = vpack.c.bf16 %v139_v15, %v138_v14  ;;  %v141_v18 = vld [vmem:[%s462_s3 + $0x38] sm:$0xff]  ;;  %v251_v20 = vld [vmem:[%s461_s2] ss:$0 sm:$0xff]  ;;  %p335_p0 = scmp.ne.s32.totalorder %s241_s22, %s334_s23  ;;  %p340_p2 = scmp.lt.s32.totalorder %s334_s23, %s334_s23 }
   0x8   :  { %312 = vmatprep.subr.bf16.mxu1 %v311_v11  ;;  %v323_v19 = vpack.c.bf16 %v141_v18, %v140_v17  ;;  %v254_v43 = vld [vmem:[%s463_s4] ss:$0 sm:$0xff] }
   0x9   :  { %310 = vmatpush3.bf16.msra.mxu0 %v307_v6  ;;  %314 = vmatpush3.bf16.msra.mxu1 %v311_v11  ;;  %p341_p3 = por %p340_p2, %p339_p1 }
   0xa   :  { %316 = vmatprep.subr.bf16.mxu1 %v315_v13 }
   0xb   :  { %p342_p4 = pnand %p341_p3, %p335_p0 }
   0xc   :  { %282 = vmatmul.mubr.msk.f32.vlgmr.msra.gmra.mrb[0].mxu0 %vm34_vm0, %v22_v7 }
   0xd   :  { %318 = vmatpush3.bf16.msra.mxu1 %v315_v13 }
   0xe   :  { %320 = vmatprep.subr.bf16.mxu1 %v319_v16 }
  0x11   :  { %322 = vmatpush3.bf16.msra.mxu1 %v319_v16 }
  0x12   :  { %324 = vmatprep.subr.bf16.mxu1 %v323_v19 }
  0x15   :  { %326 = vmatpush3.bf16.msra.mxu1 %v323_v19 }
  0xdf   :  { %v283_v21 = vpop.f32.mrb[0].mxu0 }
  0xe0   :  { %v113_v22 = vadd.f32 %v283_v21, %v251_v20  ;;  %v107_v23 = vpop.f32.mrb[1].mxu0 }
  0xe1   :  { %v108_v24 = vadd.f32 %v251_v20, %v107_v23 }
  0xe2   :  { %v117_v25 = vmul.f32 %v113_v22, %v113_v22 }
  0xe3   :  { %v116_v26 = vmul.f32 %v108_v24, %v108_v24 }
  0xe4   :  { %v119_v27 = vmul.f32 %v117_v25, %v113_v22 }
  0xe5   :  { %v118_v28 = vmul.f32 %v116_v26, %v108_v24 }
  0xe6   :  { %v121_v29 = vmul.f32 0.044715, %v119_v27 }
  0xe7   :  { %v120_v30 = vmul.f32 0.044715, %v118_v28 }
  0xe8   :  { %v123_v31 = vadd.f32 %v121_v29, %v113_v22 }
  0xe9   :  { %v122_v32 = vadd.f32 %v120_v30, %v108_v24 }
  0xea   :  { %v125_v33 = vmul.f32 0.7978846, %v123_v31 }
  0xeb   :  { %v124_v34 = vmul.f32 0.7978846, %v122_v32 }
  0xec   :  { %330 = vtanh.f32 %v125_v33 }
  0xed   :  { %332 = vtanh.f32 %v124_v34 }
  0xf6   :  { %v331_v35 = vpop.eup %330 }
  0xf7   :  { %v333_v36 = vpop.eup %332  ;;  %v129_v37 = vadd.f32 1.0, %v331_v35 }
  0xf8   :  { %v128_v38 = vadd.f32 1.0, %v333_v36 }
  0xf9   :  { %v131_v39 = vmul.f32 0.5, %v129_v37 }
  0xfa   :  { %v130_v40 = vmul.f32 0.5, %v128_v38 }
  0xfb   :  { %v133_v42 = vmul.f32 %v131_v39, %v113_v22 }
  0xfc   :  { %v132_v41 = vmul.f32 %v130_v40, %v108_v24 }
  0xfe   :  { %300 = vmatprep.mubr.msk.f32.mxu1 %vm149_vm1, %v132_v41 }
  0xff   :  { %301 = vmatmul.mubr.msk.f32.vlgmr.msra.gmra.mrb[0].mxu1 %vm149_vm1, %v133_v42 }
 0x1d2   :  { %v302_v44 = vpop.f32.mrb[0].mxu1 }
 0x1d3   :  { %v228_v45 = vadd.f32 %v302_v44, %v254_v43  ;;  %v222_v46 = vpop.f32.mrb[1].mxu1 }
 0x1d4   :  { %v223_v47 = vadd.f32 %v254_v43, %v222_v46 }
 0x1d5   :  { %v232_v48 = vadd.f32 %v228_v45, %v22_v7 }
 0x1d6   :  { %v231_v49 = vadd.f32 %v223_v47, %v406_v5 }
 0x1d7   :  { %234 = vst.msk [vmem:[#allocation2 + $0x8] sm:$0xff] %vm34_vm0, %v232_v48 }
 0x1d8   :  { %233 = vst.msk [vmem:[#allocation2] sm:$0xff] %vm34_vm0, %v231_v49 }
 0x1d9   :  { %345 = shalt.err (!%p342_p4)
}
 0x1da   :  { %s346_s25 = scalar_lea.hbm %s464_s5, 256 }
 0x1db   :  { %p347_p5 = scmp.ne.s32.totalorder %s464_s5, %s346_s25  ;;  %p350_p6 = scmp.lt.u32.totalorder %s346_s25, %s464_s5 }
 0x1dd   :  { %p352_p7 = pnand %p350_p6, %p347_p5 }
 0x1df   :  { %355 = shalt.err (!%p352_p7)
}
 0x1e0   :  { %s359_s1 = smov 128   ;;  %s360_s30 = smov 8  }
 0x1e1   :  { %246 = dma.vmem_to_hbm [thread:$0]  %s241_s22, 256, %s464_s5, [#allocation3], %s359_s1, %s359_s1, %s360_s30  }
 0x1e2   :  { %356 = dma.done.wait [#allocation3], 256  }
 0x1e3   :  { %357 = vsyncadd [#allocation3], 4294967040 }
 0x1e4   :  { %250 = vsyncpa [#allocation3], 1 }

</bundles_post_ra>
